<compile_context>
chip_gen: v6e
topology: v6e:2x2x1
jax: 0.10.0
libtpu: 0.0.40
codegen_flags: <defaults>
</compile_context>

<pallas_src>
import functools

import jax
import jax.numpy as jnp
from jax import lax
from jax.experimental import pallas as pl
from jax.experimental.pallas import tpu as pltpu

_LANES = 128
_SUBLANES = 8


def _tpu_defaults():
    """Returns (fused_slab_cap_bytes, default_tile_rows) per TPU generation."""
    try:
        kind = jax.devices()[0].device_kind.lower()
    except Exception:  # pragma: no cover - defensive
        kind = ""
    if "v7" in kind or "7x" in kind:
        # v7x: 64 MiB physical VMEM per TensorCore -> keep resident slab <= 24 MiB
        return 24 << 20, 4096
    if "v6" in kind:
        # v6e: 128 MiB physical VMEM
        return 40 << 20, 2048
    if "v5e" in kind or "v5 lite" in kind or "v5lite" in kind:
        # v5e: 128 MiB physical VMEM
        return 40 << 20, 2048
    # unknown / older generations: conservative
    return 16 << 20, 1024


# ---------------- in-kernel helpers ----------------
def _valid_mask(tile_rows, start_row, total):
    """Element-granularity validity mask for a (tile_rows, 128) tile."""
    r = lax.broadcasted_iota(jnp.int32, (tile_rows, _LANES), 0)
    c = lax.broadcasted_iota(jnp.int32, (tile_rows, _LANES), 1)
    flat_idx = (start_row + r) * _LANES + c
    return flat_idx < total


def _fold_minmax(mn_acc, mx_acc, lo, hi, tile_rows):
    """Fold a (tile_rows,128) tile into persistent (8,128) accumulators (VPU)."""
    if tile_rows % _SUBLANES == 0:
        lo = jnp.min(lo.reshape(tile_rows // _SUBLANES, _SUBLANES, _LANES), axis=0)
        hi = jnp.max(hi.reshape(tile_rows // _SUBLANES, _SUBLANES, _LANES), axis=0)
        mn_acc[...] = jnp.minimum(mn_acc[...], lo)
        mx_acc[...] = jnp.maximum(mx_acc[...], hi)
    else:
        # tiny single-tile inputs whose row count is not a sublane multiple
        mn_acc[...] = jnp.minimum(mn_acc[...], jnp.min(lo))
        mx_acc[...] = jnp.maximum(mx_acc[...], jnp.max(hi))


# ---------------- fused resident-slab kernel (input fits VMEM) ----------------
def _fused_kernel(params_ref, x_ref, o_ref, slab_ref, mn_acc, mx_acc,
                  *, n_tiles, tile_rows, total, needs_mask):
    i = pl.program_id(0)

    @pl.when(i == 0)
    def _init():
        mn_acc[...] = jnp.full(mn_acc.shape, jnp.inf, mn_acc.dtype)
        mx_acc[...] = jnp.full(mx_acc.shape, -jnp.inf, mx_acc.dtype)

    # ---- phase 1: stream input tiles into the resident slab, fold min/max ----
    @pl.when(i < n_tiles)
    def _phase1():
        x = x_ref[...]
        start = i * tile_rows
        slab_ref[pl.ds(start, tile_rows), :] = x
        xf = x.astype(jnp.float32)
        if needs_mask:
            mask = _valid_mask(tile_rows, start, total)
            lo = jnp.where(mask, xf, jnp.inf)
            hi = jnp.where(mask, xf, -jnp.inf)
        else:
            lo = xf
            hi = xf
        _fold_minmax(mn_acc, mx_acc, lo, hi, tile_rows)

    # ---- phase 2: clamp from the slab and write output tiles ----
    @pl.when(i >= n_tiles)
    def _phase2():
        j = i - n_tiles
        xs = slab_ref[pl.ds(j * tile_rows, tile_rows), :].astype(jnp.float32)
        mn = jnp.min(mn_acc[...])
        mx = jnp.max(mx_acc[...])
        c = params_ref[0]
        b = params_ref[1]
        o_ref[...] = jnp.clip(c * xs + b, mn, mx).astype(o_ref.dtype)


# ---------------- two-pass path: pass 1 = global min / max ----------------
def _minmax_kernel(x_ref, mn_out, mx_out, mn_acc, mx_acc,
                   *, tile_rows, total, needs_mask):
    i = pl.program_id(0)

    @pl.when(i == 0)
    def _init():
        mn_acc[...] = jnp.full(mn_acc.shape, jnp.inf, mn_acc.dtype)
        mx_acc[...] = jnp.full(mx_acc.shape, -jnp.inf, mx_acc.dtype)

    x = x_ref[...].astype(jnp.float32)
    if needs_mask:
        mask = _valid_mask(tile_rows, i * tile_rows, total)
        lo = jnp.where(mask, x, jnp.inf)
        hi = jnp.where(mask, x, -jnp.inf)
    else:
        lo = x
        hi = x
    _fold_minmax(mn_acc, mx_acc, lo, hi, tile_rows)

    @pl.when(i == pl.num_programs(0) - 1)
    def _finish():
        # reduced scalars broadcast into one-vreg outputs; consumed by pass 2
        # via SMEM, so no host-side combine dispatch sits between the kernels.
        mn_out[...] = jnp.full(mn_out.shape, jnp.min(mn_acc[...]), mn_out.dtype)
        mx_out[...] = jnp.full(mx_out.shape, jnp.max(mx_acc[...]), mx_out.dtype)


# ---------------- two-pass path: pass 2 = affine + clamp ----------------
def _clamp_kernel(params_ref, mn_ref, mx_ref, x_ref, o_ref):
    c = params_ref[0]
    b = params_ref[1]
    mn = mn_ref[0, 0]
    mx = mx_ref[0, 0]
    x = x_ref[...].astype(jnp.float32)
    o_ref[...] = jnp.clip(c * x + b, mn, mx).astype(o_ref.dtype)


def brightness_forward(x, contrast, brightness=0.2, *, force_two_pass=False,
                       tile_rows=None):
    """Pallas implementation of Brightness.forward. x: (N, C, H, W) float."""
    orig_shape = x.shape
    dtype = x.dtype
    total = int(x.size)
    if total == 0:
        return x

    fused_cap_bytes, default_tile_rows = _tpu_defaults()

    # runtime scalars (no recompile per value, jit-traceable)
    params = jnp.stack([jnp.asarray(contrast, jnp.float32),
                        jnp.asarray(brightness, jnp.float32)])

    flat = x.reshape(-1)
    pad = (-total) % _LANES
    if pad:
        # only non-lane-aligned element counts pay a pad copy; the pad content
        # is irrelevant because the kernels mask by true element index.
        flat = jnp.pad(flat, (0, pad))
    rows = (total + pad) // _LANES
    x2d = flat.reshape(rows, _LANES)

    tr = default_tile_rows if tile_rows is None else int(tile_rows)
    tr = min(tr, rows)
    if tr < rows and tr % _SUBLANES:
        tr = max(_SUBLANES, (tr // _SUBLANES) * _SUBLANES)
    n_tiles = -(-rows // tr)
    needs_mask = (n_tiles * tr * _LANES) != total

    itemsize = x2d.dtype.itemsize
    tile_bytes = tr * _LANES * itemsize
    slab_bytes = n_tiles * tr * _LANES * itemsize

    use_fused = (not force_two_pass) and (slab_bytes <= fused_cap_bytes)

    if use_fused:
        # slab + double-buffered in/out tiles + accumulators + margin
        vmem_limit = int(slab_bytes + 4 * tile_bytes + (8 << 20))
        out2d = pl.pallas_call(
            functools.partial(_fused_kernel, n_tiles=n_tiles, tile_rows=tr,
                              total=total, needs_mask=needs_mask),
            out_shape=jax.ShapeDtypeStruct((rows, _LANES), dtype),
            grid_spec=pltpu.PrefetchScalarGridSpec(
                num_scalar_prefetch=0,
                grid=(2 * n_tiles,),
                in_specs=[
                    pl.BlockSpec(memory_space=pltpu.SMEM),          # params (2,)
                    pl.BlockSpec((tr, _LANES),
                                 lambda i: (jnp.minimum(i, n_tiles - 1), 0)),
                ],
                out_specs=pl.BlockSpec((tr, _LANES),
                                       lambda i: (jnp.maximum(i - n_tiles, 0), 0)),
                scratch_shapes=[
                    pltpu.VMEM((n_tiles * tr, _LANES), x2d.dtype),   # resident slab
                    pltpu.VMEM((_SUBLANES, _LANES), jnp.float32),    # min acc
                    pltpu.VMEM((_SUBLANES, _LANES), jnp.float32),    # max acc
                ]),
            compiler_params=pltpu.CompilerParams(
                dimension_semantics=("arbitrary",),
                vmem_limit_bytes=vmem_limit),
        )(params, x2d)
    else:
        # ---- pass 1: global min / max ----
        mn, mx = pl.pallas_call(
            functools.partial(_minmax_kernel, tile_rows=tr, total=total,
                              needs_mask=needs_mask),
            out_shape=(jax.ShapeDtypeStruct((_SUBLANES, _LANES), jnp.float32),
                       jax.ShapeDtypeStruct((_SUBLANES, _LANES), jnp.float32)),
            grid_spec=pltpu.PrefetchScalarGridSpec(
                num_scalar_prefetch=0,
                grid=(n_tiles,),
                in_specs=[pl.BlockSpec((tr, _LANES), lambda i: (i, 0))],
                out_specs=(pl.BlockSpec((_SUBLANES, _LANES), lambda i: (0, 0)),
                           pl.BlockSpec((_SUBLANES, _LANES), lambda i: (0, 0))),
                scratch_shapes=[
                    pltpu.VMEM((_SUBLANES, _LANES), jnp.float32),
                    pltpu.VMEM((_SUBLANES, _LANES), jnp.float32),
                ]),
            compiler_params=pltpu.CompilerParams(
                dimension_semantics=("arbitrary",)),
        )(x2d)

        # ---- pass 2: contrast * x + brightness, clamped to [min, max] ----
        out2d = pl.pallas_call(
            _clamp_kernel,
            out_shape=jax.ShapeDtypeStruct((rows, _LANES), dtype),
            grid_spec=pltpu.PrefetchScalarGridSpec(
                num_scalar_prefetch=0,
                grid=(n_tiles,),
                in_specs=[
                    pl.BlockSpec(memory_space=pltpu.SMEM),   # params (2,)
                    pl.BlockSpec(memory_space=pltpu.SMEM),   # min (8,128)
                    pl.BlockSpec(memory_space=pltpu.SMEM),   # max (8,128)
                    pl.BlockSpec((tr, _LANES), lambda i: (i, 0)),
                ],
                out_specs=pl.BlockSpec((tr, _LANES), lambda i: (i, 0))),
            compiler_params=pltpu.CompilerParams(
                dimension_semantics=("parallel",)),
        )(params, mn, mx, x2d)

    out_flat = out2d.reshape(-1)
    if pad:
        out_flat = out_flat[:total]
    return out_flat.reshape(orig_shape)


def _reference(x, contrast, brightness):
    mn = jnp.min(x)
    mx = jnp.max(x)
    return jnp.clip(contrast * x + brightness, mn, mx)


if __name__ == "__main__":
    # Deterministic "module params" (Brightness.__init__): contrast arg, brightness=0.2
    contrast = 0.5
    brightness = 0.2

    key = jax.random.PRNGKey(0)
    x = jax.random.normal(key, (2, 4, 16, 16), dtype=jnp.float32)  # NCHW

    # main run: fused resident-slab path
    out = jax.block_until_ready(brightness_forward(x, contrast, brightness))
    ref = _reference(x, contrast, brightness)
    assert out.shape == x.shape and out.dtype == x.dtype
    assert jnp.allclose(out, ref, atol=1e-6), "fused path mismatch vs reference"

    # two-pass (large-input) path on the same small data
    out2 = jax.block_until_ready(
        brightness_forward(x, contrast, brightness, force_two_pass=True))
    assert jnp.allclose(out2, ref, atol=1e-6), "two-pass path mismatch vs reference"

    # non-128-divisible element count (exercises zero-pad + in-kernel masking)
    x_odd = jax.random.normal(jax.random.PRNGKey(0), (2, 3, 7, 11), dtype=jnp.float32)
    ref_odd = _reference(x_odd, contrast, brightness)
    out3 = jax.block_until_ready(brightness_forward(x_odd, contrast, brightness))
    out4 = jax.block_until_ready(
        brightness_forward(x_odd, contrast, brightness, force_two_pass=True))
    assert jnp.allclose(out3, ref_odd, atol=1e-6), "ragged fused path mismatch"
    assert jnp.allclose(out4, ref_odd, atol=1e-6), "ragged two-pass path mismatch"

    # multi-tile grids + ragged last tile on both paths (tiny forced tiles)
    x_mt = jax.random.normal(jax.random.PRNGKey(0), (1, 3, 33, 40), dtype=jnp.float32)
    ref_mt = _reference(x_mt, contrast, brightness)
    out5 = jax.block_until_ready(
        brightness_forward(x_mt, contrast, brightness, tile_rows=8))
    out6 = jax.block_until_ready(
        brightness_forward(x_mt, contrast, brightness, tile_rows=8,
                           force_two_pass=True))
    assert jnp.allclose(out5, ref_mt, atol=1e-6), "multi-tile fused path mismatch"
    assert jnp.allclose(out6, ref_mt, atol=1e-6), "multi-tile two-pass path mismatch"

    print("KERNEL_OK")
</pallas_src>

<mosaic_0001>
module attributes {stable_mosaic.version = 11 : i64} {
  func.func @_fused_kernel(%arg0: i32, %arg1: memref<2xf32, #tpu.memory_space<smem>>, %arg2: memref<16x128xf32, #tpu.memory_space<vmem>>, %arg3: memref<16x128xf32, #tpu.memory_space<vmem>>, %arg4: memref<16x128xf32, #tpu.memory_space<vmem>>, %arg5: memref<8x128xf32, #tpu.memory_space<vmem>>, %arg6: memref<8x128xf32, #tpu.memory_space<vmem>>) attributes {dimension_semantics = [#tpu.dimension_semantics<arbitrary>], iteration_bounds = array<i64: 2>, scalar_prefetch = 0 : i64, scratch_operands = 3 : i64, tpu.core_type = #tpu.core_type<tc>, window_params = [{transform_indices = @transform_0, window_bounds = array<i64: 2>}, {transform_indices = @transform_1, window_bounds = array<i64: 16, 128>}, {transform_indices = @transform_2, window_bounds = array<i64: 16, 128>}]} {
    %c0_i32 = arith.constant 0 : i32
    %0 = arith.cmpi eq, %arg0, %c0_i32 : i32
    %1 = arith.extui %0 : i1 to i32
    %c0_i32_0 = arith.constant 0 : i32
    %2 = arith.cmpi ne, %1, %c0_i32_0 : i32
    scf.if %2 {
      %cst = arith.constant 0x7F800000 : f32
      %9 = vector.broadcast %cst : f32 to vector<8x128xf32>
      %c0 = arith.constant 0 : index
      %c0_4 = arith.constant 0 : index
      %10 = vector.load %arg5[%c0, %c0_4] : memref<8x128xf32, #tpu.memory_space<vmem>>, vector<8x128xf32>
      tpu.vector_store %arg5[%c0, %c0_4], %9 {strides = array<i32>} : memref<8x128xf32, #tpu.memory_space<vmem>>, vector<8x128xf32>,
      %cst_5 = arith.constant 0xFF800000 : f32
      %11 = vector.broadcast %cst_5 : f32 to vector<8x128xf32>
      %c0_6 = arith.constant 0 : index
      %c0_7 = arith.constant 0 : index
      %12 = vector.load %arg6[%c0_6, %c0_7] : memref<8x128xf32, #tpu.memory_space<vmem>>, vector<8x128xf32>
      tpu.vector_store %arg6[%c0_6, %c0_7], %11 {strides = array<i32>} : memref<8x128xf32, #tpu.memory_space<vmem>>, vector<8x128xf32>,
    } else {
    }
    %c1_i32 = arith.constant 1 : i32
    %3 = arith.cmpi slt, %arg0, %c1_i32 : i32
    %4 = arith.extui %3 : i1 to i32
    %c0_i32_1 = arith.constant 0 : i32
    %5 = arith.cmpi ne, %4, %c0_i32_1 : i32
    scf.if %5 {
      %c0 = arith.constant 0 : index
      %c0_4 = arith.constant 0 : index
      %9 = vector.load %arg2[%c0, %c0_4] : memref<16x128xf32, #tpu.memory_space<vmem>>, vector<16x128xf32>
      %c16_i32 = arith.constant 16 : i32
      %10 = arith.muli %arg0, %c16_i32 : i32
      %11 = arith.index_cast %10 : i32 to index
      %c0_5 = arith.constant 0 : index
      %12 = vector.load %arg4[%11, %c0_5] : memref<16x128xf32, #tpu.memory_space<vmem>>, vector<16x128xf32>
      tpu.vector_store %arg4[%11, %c0_5], %9 {strides = array<i32>} : memref<16x128xf32, #tpu.memory_space<vmem>>, vector<16x128xf32>,
      %13 = vector.shape_cast %9 : vector<16x128xf32> to vector<2x8x128xf32>
      %cst = arith.constant dense<0x7F800000> : vector<8x128xf32>
      %14 = vector.multi_reduction <minimumf>, %13, %cst [0] : vector<2x8x128xf32> to vector<8x128xf32>
      %15 = vector.shape_cast %9 : vector<16x128xf32> to vector<2x8x128xf32>
      %cst_6 = arith.constant dense<0xFF800000> : vector<8x128xf32>
      %16 = vector.multi_reduction <maximumf>, %15, %cst_6 [0] : vector<2x8x128xf32> to vector<8x128xf32>
      %c0_7 = arith.constant 0 : index
      %c0_8 = arith.constant 0 : index
      %17 = vector.load %arg5[%c0_7, %c0_8] : memref<8x128xf32, #tpu.memory_space<vmem>>, vector<8x128xf32>
      %18 = arith.minimumf %17, %14 : vector<8x128xf32>
      %c0_9 = arith.constant 0 : index
      %c0_10 = arith.constant 0 : index
      %19 = vector.load %arg5[%c0_9, %c0_10] : memref<8x128xf32, #tpu.memory_space<vmem>>, vector<8x128xf32>
      tpu.vector_store %arg5[%c0_9, %c0_10], %18 {strides = array<i32>} : memref<8x128xf32, #tpu.memory_space<vmem>>, vector<8x128xf32>,
      %c0_11 = arith.constant 0 : index
      %c0_12 = arith.constant 0 : index
      %20 = vector.load %arg6[%c0_11, %c0_12] : memref<8x128xf32, #tpu.memory_space<vmem>>, vector<8x128xf32>
      %21 = arith.maximumf %20, %16 : vector<8x128xf32>
      %c0_13 = arith.constant 0 : index
      %c0_14 = arith.constant 0 : index
      %22 = vector.load %arg6[%c0_13, %c0_14] : memref<8x128xf32, #tpu.memory_space<vmem>>, vector<8x128xf32>
      tpu.vector_store %arg6[%c0_13, %c0_14], %21 {strides = array<i32>} : memref<8x128xf32, #tpu.memory_space<vmem>>, vector<8x128xf32>,
    } else {
    }
    %c1_i32_2 = arith.constant 1 : i32
    %6 = arith.cmpi sge, %arg0, %c1_i32_2 : i32
    %7 = arith.extui %6 : i1 to i32
    %c0_i32_3 = arith.constant 0 : i32
    %8 = arith.cmpi ne, %7, %c0_i32_3 : i32
    scf.if %8 {
      %c1_i32_4 = arith.constant 1 : i32
      %9 = arith.subi %arg0, %c1_i32_4 : i32
      %c16_i32 = arith.constant 16 : i32
      %10 = arith.muli %9, %c16_i32 : i32
      %11 = arith.index_cast %10 : i32 to index
      %c0 = arith.constant 0 : index
      %12 = vector.load %arg4[%11, %c0] : memref<16x128xf32, #tpu.memory_space<vmem>>, vector<16x128xf32>
      %c0_5 = arith.constant 0 : index
      %c0_6 = arith.constant 0 : index
      %13 = vector.load %arg5[%c0_5, %c0_6] : memref<8x128xf32, #tpu.memory_space<vmem>>, vector<8x128xf32>
      %14 = vector.shape_cast %13 : vector<8x128xf32> to vector<1x8x128xf32>
      %cst = arith.constant dense<0x7F800000> : vector<1xf32>
      %15 = vector.multi_reduction <minimumf>, %14, %cst [1, 2] : vector<1x8x128xf32> to vector<1xf32>
      %16 = vector.shape_cast %15 : vector<1xf32> to vector<1x1x1xf32>
      %17 = vector.extract %16[0, 0, 0] : f32 from vector<1x1x1xf32>
      %c0_7 = arith.constant 0 : index
      %c0_8 = arith.constant 0 : index
      %18 = vector.load %arg6[%c0_7, %c0_8] : memref<8x128xf32, #tpu.memory_space<vmem>>, vector<8x128xf32>
      %19 = vector.shape_cast %18 : vector<8x128xf32> to vector<1x8x128xf32>
      %cst_9 = arith.constant dense<0xFF800000> : vector<1xf32>
      %20 = vector.multi_reduction <maximumf>, %19, %cst_9 [1, 2] : vector<1x8x128xf32> to vector<1xf32>
      %21 = vector.shape_cast %20 : vector<1xf32> to vector<1x1x1xf32>
      %22 = vector.extract %21[0, 0, 0] : f32 from vector<1x1x1xf32>
      %c0_10 = arith.constant 0 : index
      %23 = memref.load %arg1[%c0_10] : memref<2xf32, #tpu.memory_space<smem>>
      %c1 = arith.constant 1 : index
      %24 = memref.load %arg1[%c1] : memref<2xf32, #tpu.memory_space<smem>>
      %25 = vector.broadcast %23 : f32 to vector<16x128xf32>
      %26 = arith.mulf %25, %12 : vector<16x128xf32>
      %27 = vector.broadcast %24 : f32 to vector<16x128xf32>
      %28 = arith.addf %26, %27 : vector<16x128xf32>
      %29 = vector.broadcast %17 : f32 to vector<16x128xf32>
      %30 = arith.maximumf %29, %28 : vector<16x128xf32>
      %31 = vector.broadcast %22 : f32 to vector<16x128xf32>
      %32 = arith.minimumf %31, %30 : vector<16x128xf32>
      %c0_11 = arith.constant 0 : index
      %c0_12 = arith.constant 0 : index
      %33 = vector.load %arg3[%c0_11, %c0_12] : memref<16x128xf32, #tpu.memory_space<vmem>>, vector<16x128xf32>
      tpu.vector_store %arg3[%c0_11, %c0_12], %32 {strides = array<i32>} : memref<16x128xf32, #tpu.memory_space<vmem>>, vector<16x128xf32>,
    } else {
    }
    return
  }
  func.func @transform_0(%arg0: i32) -> i32 {
    %c0_i32 = arith.constant 0 : i32
    %c0_i32_0 = arith.constant 0 : i32
    return %c0_i32 : i32
  }
  func.func @transform_1(%arg0: i32) -> (i32, i32) {
    %c0_i32 = arith.constant 0 : i32
    %0 = arith.minsi %arg0, %c0_i32 : i32
    %c0_i32_0 = arith.constant 0 : i32
    %c0_i32_1 = arith.constant 0 : i32
    return %0, %c0_i32_0 : i32, i32
  }
  func.func @transform_2(%arg0: i32) -> (i32, i32) {
    %c1_i32 = arith.constant 1 : i32
    %0 = arith.subi %arg0, %c1_i32 : i32
    %c0_i32 = arith.constant 0 : i32
    %1 = arith.maxsi %0, %c0_i32 : i32
    %c0_i32_0 = arith.constant 0 : i32
    %c0_i32_1 = arith.constant 0 : i32
    return %1, %c0_i32_0 : i32, i32
  }
}

</mosaic_0001>

<bundles_post_ra>
// kernel: tpu_custom_call.1
= control target key start
LH: loop header
LB: loop body
LE: loop exit
PB: predicated region body
PF: predicated region fallthrough
CT: control target
= control target key end

     0   :  { %7 = vsyncpa [#allocation8], 0  ;;  %s870_s0 = inlined_call_operand.hbm [shape: f32[2], index: 0, kind: input, shape index: {}]   ;;  %s871_s1 = inlined_call_operand.hbm [shape: f32[16,128], index: 1, kind: input, shape index: {}]   ;;  %s872_s2 = inlined_call_operand.hbm [shape: f32[16,128], index: 2, kind: output, shape index: {}]  }
   0x1   :  { %8 = vsyncpa [#allocation6], 0 }
   0x2   :  { %10 = vsyncpa [#allocation6 + $0x1], 0 }
   0x3   :  { %11 = vsyncpa [#allocation7], 0 }
   0x4   :  { %13 = vsyncpa [#allocation7 + $0x1], 0  ;;  %s644_s9 = smov 0   ;;  %s646_s10 = smov 0  }
   0x5   :  { %s648_s11 = smov 0   ;;  %s650_s12 = smov 0  }
   0x6   :  { %s652_s13 = smov 0   ;;  %s654_s14 = smov 0  }
   0x7   :  { %s656_s15 = smov 0  }
   0x8 LB: > { %879 = sst [smem:[#allocation14_spill]] %s594_s9  ;;  %s678_s16 = sadd.s32 4294967295, %s618_s15   ;;  %s618_s15 = sphi %s656_s15, %s905_s15   ;;  %s614_s14 = sphi %s654_s14, %s904_s14   ;;  %s610_s13 = sphi %s652_s13, %s903_s13   ;;  %s606_s12 = sphi %s650_s12, %s902_s12   ;;  %s602_s11 = sphi %s648_s11, %s901_s11   ;;  %s598_s10 = sphi %s646_s10, %s900_s10   ;;  %s594_s9 = sphi %s644_s9, %s899_s9  }
   0x9   : > { %s368_s17 = sadd.s32 4294967294, %s618_s15   ;;  %s51_s18 = sadd.s32 1, %s614_s14 }
   0xa   : > { %p58_p0 = scmp.ne.s32.totalorder %s614_s14, %s610_s13  ;;  %p59_p1 = scmp.eq.s32.totalorder %s618_s15, 0 }
   0xb   : > { %p64_p2 = scmp.ne.s32.totalorder %s610_s13, %s606_s12  ;;  %p873_p3 = scmp.eq.s32.totalorder %s678_s16, 0 }
   0xc   : > { %p75_p4 = scmp.gt.s32.totalorder %s678_s16, 0  ;;  %p688_p5 = por %p59_p1, %p58_p0 }
   0xd   : > { %s83_s20 = sadd.s32 1, %s602_s11  ;;  %p695_p6 = por %p873_p3, %p64_p2 }
   0xe   : > { %p93_p7 = scmp.ne.s32.totalorder %s602_s11, %s598_s10  ;;  %p94_p8 = scmp.eq.s32.totalorder %s678_s16, 1 }
   0xf   : > { %s881_s21 = scalar_select %p695_p6, 1, 0 }
  0x10   : > { %s702_s22 = scalar_select %p75_p4, %s678_s16, 0 }
  0x11   : > { %p99_p9 = scmp.ne.s32.totalorder %s598_s10, %s594_s9  ;;  %p100_p10 = scmp.eq.s32.totalorder %s368_s17, 1 }
  0x12   : > { %p371_p11 = scmp.ge.s32.totalorder %s618_s15, 1  ;;  %p708_p12 = por %p94_p8, %p93_p7 }
  0x13   : > { %p107_p13 = scmp.lt.s32.totalorder %s618_s15, 3  ;;  %p713_p0 = por %p100_p10, %p99_p9 }
  0x14   : > { %s882_s23 = scalar_select %p708_p12, 1, 0 }
  0x15   : > { %s883_s24 = scalar_select %p713_p0, 1, 0 }
  0x16   : > { %p718_p2 = pnand %p371_p11, %p107_p13  ;;  %p421_p3 = scmp.lt.s32.totalorder %s618_s15, 2 }
  0x17   : > { %884 = sst [smem:[#allocation15_spill]] %s883_s24  ;;  %s727_s26 = sadd.s32 1, %s618_s15  }
  0x18   : > { %s885_s25 = scalar_select %p718_p2, 1, 0 }
  0x19   : > { %p408_p7 = pneg %p718_p2  ;;  %p731_p8 = pnand %p421_p3, %p688_p5 }
  0x1a   : > { %p44_p9 = scmp.lt.s32.totalorder %s618_s15, 0  ;;  %p887_p10 = scmp.eq.s32.totalorder %s678_s16, 0 }
  0x1b   : > { %p46_p13 = scmp.lt.s32.totalorder %s727_s26, 0  ;;  %s370_s28 = sadd.s32 4294967295, %s727_s26 }
  0x1c   : > { %p409_p11 = pnand %p408_p7, %p887_p10  ;;  %p78_p4 = scmp.gt.s32.totalorder %s370_s28, 0 }
  0x1d   : > { %s620_s29 = smov [#allocation5]   ;;  %s129_s7 = sand.u32 1, %s614_s14  }
  0x1e   : > { %411 = dma.hbm_to_smem (!%p409_p11), %s870_s0, 16, %s620_s29, [#allocation8]  }
  0x1f   : > { %s45_s4 = scalar_select %p44_p9, %s618_s15, 0 }
  0x20   : > { %s47_s5 = scalar_select %p46_p13, %s727_s26, 0 }
  0x21   : > { %s907_s28 = smov (!%p78_p4, %s370_s28), 0  ;;  %s374_s19 = sshll.u32 %s129_s7, 4 }
  0x22   : > { %s48_s6 = ssub.s32 %s45_s4, %s47_s5  ;;  %s80_s8 = ssub.s32 %s702_s22, %s907_s28 }
  0x23   : > { %p49_p3 = scmp.eq.s32.totalorder %s48_s6, 0  ;;  %p81_p5 = scmp.eq.s32.totalorder %s80_s8, 0 }
  0x24   : > { %s394_s24 = sshll.u32 %s45_s4, 8  ;;  %s133_s3 = scalar_lea.vmem [#allocation9], %s374_s19 }
  0x25   : > { %s750_s12 = scalar_select %p49_p3, %s614_s14, %s51_s18  }
  0x26   : > { %s755_s17 = scalar_select %p81_p5, %s602_s11, %s83_s20  }
  0x27   : > { %s760_s29 = scalar_lea.hbm %s871_s1, %s394_s24  ;;  %s142_s5 = sshll.u32 %s133_s3, 4  ;;  %s762_s5 = int_to_ptr.vmem [resolvable:$true] %s142_s5 }
  0x28   : > { %s764_s22 = scalar_lea.sflag [#allocation6], %s129_s7  ;;  %s498_s18 = scalar_lea.hbm %s760_s29, 256 }
  0x29   : > { %p499_p4 = scmp.ne.s32.totalorder %s760_s29, %s498_s18  ;;  %p500_p7 = pneg %p731_p8 }
  0x2a   : > { %s503_s9 = scalar_lea.hbm %s871_s1, 256  ;;  %p504_p11 = scmp.lt.s32.totalorder %s760_s29, %s871_s1 }
  0x2b   : > { %p501_p9 = pnand %p500_p7, %p499_p4  ;;  %p505_p13 = scmp.lt.s32.totalorder %s503_s9, %s498_s18 }
  0x2d   : > { %p502_p10 = pneg %p501_p9  ;;  %p506_p3 = por %p505_p13, %p504_p11 }
  0x2f   : > { %p507_p5 = pnand %p506_p3, %p502_p10 }
  0x31   : > { %510 = shalt.err (!%p507_p5)
}
  0x32   : > { %s511_s6 = scalar_lea.vmem %s762_s5, 256  ;;  %s621_s7 = smov [#allocation9]  }
  0x33   : > { %p512_p1 = scmp.ne.s32.totalorder %s762_s5, %s511_s6  ;;  %s516_s8 = sshll.u32 %s621_s7, 4  ;;  %s517_s8 = int_to_ptr.vmem [resolvable:$false] %s516_s8 }
  0x34   : > { %s518_s19 = scalar_lea.vmem %s517_s8, 512  ;;  %p519_p9 = scmp.lt.s32.totalorder %s762_s5, %s517_s8 }
  0x35   : > { %p514_p0 = pnand %p512_p1, %p500_p7  ;;  %p520_p12 = scmp.lt.s32.totalorder %s518_s19, %s511_s6 }
  0x37   : > { %p515_p4 = pneg %p514_p0  ;;  %p521_p6 = por %p520_p12, %p519_p9 }
  0x39   : > { %p522_p2 = pnand %p521_p6, %p515_p4 }
  0x3b   : > { %525 = shalt.err (!%p522_p2)
}
  0x3c   : > { %s622_s30 = smov 128   ;;  %s623_s3 = smov 8  }
  0x3d   : > { %415 = dma.hbm_to_vmem [thread:$0]  (!%p731_p8), %s760_s29, 256, %s762_s5, %s764_s22, %s622_s30, %s622_s30, %s623_s3  }
  0x3e   : > { %p888_p1 = scmp.ne.s32.totalorder %s885_s25, 0 }
  0x3f   : > { %p889_p0 = scmp.eq.s32.totalorder (!%p888_p1), %s678_s16, 0 }
  0x40   : > { %154 = sbr.rel (%p888_p1) target bundleno = 341 (0x155), region = 28 }
  0x45   : > { %581 = dma.done.wait (%p889_p0), [#allocation8], 16   ;;  %p890_p7 = pmov %p889_p0 }
  0x46   : > { %s160_s18 = sand.u32 1, %s610_s13   ;;  %p891_p6 = scmp.ne.s32.totalorder %s881_s21, 0 }
  0x47   : > { %583 = vsyncadd (%p890_p7), [#allocation8], 4294967280  ;;  %s379_s20 = sshll.u32 %s160_s18, 4  ;;  %s161_s28 = scalar_lea.sflag [#allocation6], %s160_s18 }
  0x48   : > { %s164_s9 = scalar_lea.vmem [#allocation9], %s379_s20 }
  0x49   : > { %585 = dma.done.wait (%p891_p6), %s161_s28, 256  }
  0x4a   : > { %587 = vsyncadd (%p891_p6), %s161_s28, 4294967040 }
  0x4b   : > { %169 = sfence }
  0x4c   : > { %s183_s25 = sand.u32 1, %s598_s10   ;;  %p892_p12 = scmp.ne.s32.totalorder %s678_s16, 0 }
  0x4d   : > { %s380_s27 = sshll.u32 %s183_s25, 4 }
  0x4e   : > { %s799_s29 = scalar_lea.vmem [#allocation10], %s380_s27  ;;  %196 = sbr.rel (%p892_p12) target bundleno = 85 (0x55), region = 40 }
  0x53   : > { %v624_v0 = vmov inf   ;;  %v625_v1 = vmov -inf  }
  0x54   : > { %197 = vst [vmem:[#allocation3] sm:$0xff] %v624_v0  ;;  %198 = vst [vmem:[#allocation4] sm:$0xff] %v625_v1 }
  0x55 PF: > { %p382_p2 = scmp.ge.s32.totalorder %s678_s16, 1 }
  0x56   : > { %s383_s21 = sshll.u32 (!%p382_p2), %s678_s16, 4 }
  0x57   : > { %202 = sbr.rel (%p382_p2) target bundleno = 98 (0x62), region = 44  ;;  %s206_s5 = scalar_lea.vmem (!%p382_p2), [#allocation2], %s383_s21 }
  0x5c   : > { %v203_v2 = vld [vmem:[%s164_s9] sm:$0xff]  ;;  %v204_v3 = vld [vmem:[%s164_s9 + $0x8] sm:$0xff] }
  0x5d   : > { %v211_v4 = vld [vmem:[#allocation3] sm:$0xff]  ;;  %v209_v5 = vmin.f32 %v203_v2, %v204_v3  ;;  %v210_v6 = vmax.f32 %v203_v2, %v204_v3  ;;  %v214_v7 = vld [vmem:[#allocation4] sm:$0xff]  ;;  %207 = vst [vmem:[%s206_s5] sm:$0xff] %v203_v2  ;;  %208 = vst [vmem:[%s206_s5 + $0x8] sm:$0xff] %v204_v3 }
  0x5f   : > { %v212_v8 = vmin.f32 %v211_v4, %v209_v5  ;;  %v215_v9 = vmax.f32 %v214_v7, %v210_v6 }
  0x61   : > { %213 = vst [vmem:[#allocation3] sm:$0xff] %v212_v8  ;;  %216 = vst [vmem:[#allocation4] sm:$0xff] %v215_v9 }
  0x62 PF: > { %p384_p8 = scmp.lt.s32.totalorder %s678_s16, 1 }
  0x63   : > { %s385_s22 = sadd.s32 (!%p384_p8), 4294967295, %s678_s16  ;;  %s246_s24 = sld [smem:[#allocation5]] (!%p384_p8) }
  0x64   : > { %220 = sbr.rel (%p384_p8) target bundleno = 314 (0x13a), region = 48  ;;  %s386_s4 = sshll.u32 (!%p384_p8), %s385_s22, 4 }
  0x65   : > { %s387_s6 = sld [smem:[#allocation5 + $0x1]] (!%p384_p8)  ;;  %s223_s7 = scalar_lea.vmem (!%p384_p8), [#allocation2], %s386_s4 }
  0x69   : > { %v226_v10 = vld [vmem:[#allocation3] sm:$0xff]  ;;  %v236_v11 = vld [vmem:[#allocation4] sm:$0xff]  ;;  %v224_v26 = vld [vmem:[%s223_s7] sm:$0xff]  ;;  %v248_v28 = vstv %s246_s24 }
  0x6a   : > { %227 = vmin.xlane.f32.xlu0 %v226_v10  ;;  %v225_v27 = vld [vmem:[%s223_s7 + $0x8] sm:$0xff]  ;;  %v249_v29 = vmul.f32 %v248_v28, %v224_v26 }
  0x6b   : > { %v250_v30 = vmul.f32 %v248_v28, %v225_v27  ;;  %v251_v31 = vstv %s387_s6 }
  0x6c   : > { %v252_v32 = vadd.f32 %v251_v31, %v249_v29 }
  0x6d   : > { %v253_v33 = vadd.f32 %v251_v31, %v250_v30 }
  0x6e   : > { %237 = vmax.xlane.f32.xlu0 %v236_v11 }
  0xf3   : > { %v228_v12 = vpop.xlane.xlu0 %227 }
  0xf4   : > { %v229_v13 = vrot.slane %v228_v12, 4 }
  0xf6   : > { %v230_v14 = vmin.f32 %v228_v12, %v229_v13 }
  0xf7   : > { %v238_v15 = vpop.xlane.xlu0 %237 }
  0xf8   : > { %v231_v16 = vrot.slane %v230_v14, 2  ;;  %v239_v17 = vrot.slane %v238_v15, 4 }
  0xfa   : > { %v240_v18 = vmax.f32 %v238_v15, %v239_v17  ;;  %v232_v19 = vmin.f32 %v230_v14, %v231_v16 }
  0xfc   : > { %v241_v20 = vrot.slane %v240_v18, 2  ;;  %v233_v21 = vrot.slane %v232_v19, 1 }
  0xfe   : > { %v242_v22 = vmax.f32 %v240_v18, %v241_v20  ;;  %v234_v23 = vmin.f32 %v232_v19, %v233_v21 }
 0x100   : > { %396 = vpush %v234_v23  ;;  %v243_v24 = vrot.slane %v242_v22, 1 }
 0x102   : > { %v244_v25 = vmax.f32 %v242_v22, %v243_v24 }
 0x104   : > { %398 = vpush %v244_v25 }
 0x131   : > { %s397_s8 = spop %396 }
 0x132   : > { %v254_v34 = vstv %s397_s8 }
 0x133   : > { %v255_v35 = vmax.f32 %v254_v34, %v252_v32  ;;  %v256_v36 = vmax.f32 %v254_v34, %v253_v33 }
 0x135   : > { %s399_s19 = spop %398 }
 0x136   : > { %v257_v37 = vstv %s399_s19 }
 0x137   : > { %v258_v38 = vmin.f32 %v257_v37, %v255_v35  ;;  %v259_v39 = vmin.f32 %v257_v37, %v256_v36 }
 0x139   : > { %260 = vst [vmem:[%s799_s29] sm:$0xff] %v258_v38  ;;  %261 = vst [vmem:[%s799_s29 + $0x8] sm:$0xff] %v259_v39 }
 0x13a PF: > { %s389_s30 = sadd.s32 4294967295, %s678_s16  ;;  %s279_s3 = sshll.u32 %s799_s29, 4  ;;  %s811_s3 = int_to_ptr.vmem [resolvable:$true] %s279_s3 }
 0x13b   : > { %p271_p10 = scmp.gt.s32.totalorder %s389_s30, 0  ;;  %s820_s27 = scalar_lea.sflag [#allocation7], %s183_s25 }
 0x13c   : > { %s526_s21 = scalar_lea.vmem %s811_s3, 256  ;;  %p893_p13 = scmp.ne.s32.totalorder %s882_s23, 0 }
 0x13d   : > { %s909_s30 = smov (!%p271_p10, %s389_s30), 0  ;;  %p527_p11 = scmp.ne.s32.totalorder %s811_s3, %s526_s21 }
 0x13e   : > { %s395_s18 = sshll.u32 %s909_s30, 8  ;;  %s626_s16 = smov [#allocation10]  }
 0x13f   : > { %s816_s9 = scalar_lea.hbm %s872_s2, %s395_s18  ;;  %p528_p3 = pnand %p527_p11, %p893_p13 }
 0x140   : > { %s530_s29 = sshll.u32 %s626_s16, 4  ;;  %s531_s29 = int_to_ptr.vmem [resolvable:$false] %s530_s29 }
 0x141   : > { %p529_p5 = pneg %p528_p3  ;;  %s532_s5 = scalar_lea.vmem %s531_s29, 512 }
 0x142   : > { %p533_p4 = scmp.lt.s32.totalorder %s811_s3, %s531_s29  ;;  %p534_p9 = scmp.lt.s32.totalorder %s532_s5, %s526_s21 }
 0x144   : > { %p535_p1 = por %p534_p9, %p533_p4 }
 0x146   : > { %p536_p0 = pnand %p535_p1, %p529_p5 }
 0x148   : > { %539 = shalt.err (!%p536_p0)
}
 0x149   : > { %s540_s25 = scalar_lea.hbm %s816_s9, 256  ;;  %s544_s4 = scalar_lea.hbm %s872_s2, 256 }
 0x14a   : > { %p541_p7 = scmp.ne.s32.totalorder %s816_s9, %s540_s25  ;;  %p545_p2 = scmp.lt.s32.totalorder %s816_s9, %s872_s2 }
 0x14b   : > { %p546_p8 = scmp.lt.s32.totalorder %s544_s4, %s540_s25 }
 0x14c   : > { %p542_p6 = pnand %p541_p7, %p893_p13 }
 0x14d   : > { %p547_p10 = por %p546_p8, %p545_p2 }
 0x14e   : > { %p543_p12 = pneg %p542_p6 }
 0x150   : > { %p548_p11 = pnand %p547_p10, %p543_p12 }
 0x152   : > { %551 = shalt.err (!%p548_p11)
}
 0x153   : > { %s627_s8 = smov 128   ;;  %s628_s19 = smov 8  }
 0x154   : > { %406 = dma.vmem_to_hbm [thread:$0]  (%p893_p13), %s811_s3, 256, %s816_s9, %s820_s27, %s627_s8, %s627_s8, %s628_s19  }
 0x155 PF: > { %s894_s30 = sld [smem:[#allocation14_spill]]  ;;  %p897_p5 = scmp.ge.s32.totalorder %s618_s15, 2 }
 0x156   : > { %s895_s18 = sld [smem:[#allocation15_spill]] }
 0x15b   : > { %s294_s20 = sand.u32 1, %s894_s30  }
 0x15c   : > { %p896_p3 = scmp.ne.s32.totalorder %s895_s18, 0  ;;  %s295_s28 = scalar_lea.sflag [#allocation7], %s294_s20 }
 0x15e   : > { %p417_p4 = pnand %p897_p5, %p896_p3 }
 0x160   : > { %p418_p9 = pneg %p417_p4 }
 0x162   : > { %589 = dma.done.wait (%p418_p9), %s295_s28, 256  }
 0x163   : > { %591 = vsyncadd (%p418_p9), %s295_s28, 4294967040  ;;  %s898_s23 = smov %s750_s12  ;;  %p16_p13 = scmp.ge.s32.totalorder %s727_s26, 4  }
 0x164   : > { %s899_s9 = smov %s598_s10  ;;  %s900_s10 = smov %s602_s11 }
 0x165   : > { %s901_s11 = smov %s755_s17  ;;  %s902_s12 = smov %s610_s13 }
 0x166   : > { %s903_s13 = smov %s614_s14  ;;  %s904_s14 = smov %s898_s23 }
 0x167   : > { %s905_s15 = smov %s727_s26  ;;  %18 = sbr.rel (!%p16_p13) target bundleno = 8 (0x8), region = 92 }
 0x16c   :  { %300 = vsyncpa [#allocation6], 1 }
 0x16d   :  { %302 = vsyncpa [#allocation6 + $0x1], 1 }
 0x16e   :  { %303 = vsyncpa [#allocation7], 1 }
 0x16f   :  { %305 = vsyncpa [#allocation7 + $0x1], 1 }
 0x170   :  { %306 = vsyncpa [#allocation8], 1 }
 0x171   :  { %308 = vsyncpa [#allocation8 + $0x1], 1 }

</bundles_post_ra>
